<compile_context>
chip_gen: v7x
topology: tpu7x:2x2x1
jax: 0.10.0
libtpu: 0.0.40
codegen_flags: <defaults>
</compile_context>

<pallas_src>
import jax
import jax.numpy as jnp
from jax import lax
from jax.experimental import pallas as pl
from jax.experimental.pallas import tpu as pltpu

_NUM_CLASSES = 2


def _defect_head_kernel(vec_ref, w_ref, b_ref, labels_ref, prob_ref, rowloss_ref):
    """One batch block of the classifier head.

    vec_ref:     [Bt, H]  CLS rows in the encoder's native dtype (bf16 or f32)
    w_ref:       [H, 2]   classifier weight transposed, same dtype as vec
    b_ref:       [1, 2]   f32 bias
    labels_ref:  [Bt, 1]  int32 labels
    prob_ref:    [Bt, 2]  f32 softmax probabilities
    rowloss_ref: [Bt, 1]  f32 per-row cross-entropy (-log p[label])
    """
    # Native-dtype MXU matmul, f32 accumulation. No f32 pre-cast of vec.
    logits = jnp.dot(vec_ref[...], w_ref[...],
                     preferred_element_type=jnp.float32)            # [Bt, 2]
    logits = logits + b_ref[...].astype(jnp.float32)

    # Numerically stable softmax over the 2 real classes.
    m = jnp.max(logits, axis=1, keepdims=True)                      # [Bt, 1]
    e = jnp.exp(logits - m)                                         # [Bt, 2]
    s = jnp.sum(e, axis=1, keepdims=True)                           # [Bt, 1]
    inv_s = pl.reciprocal(s, approx=True)                           # EUP slot
    prob_ref[...] = (e * inv_s).astype(prob_ref.dtype)

    # Per-row cross-entropy; the mean over B is done in the wrapper so the batch
    # grid axis has no cross-step accumulator and can stay "parallel" (megacore).
    logp = (logits - m) - jnp.log(s)                                # [Bt, 2]
    col = lax.broadcasted_iota(jnp.int32, logits.shape, 1)          # [Bt, 2]
    onehot = (labels_ref[...] == col).astype(jnp.float32)           # [Bt, 2]
    rowloss_ref[...] = -jnp.sum(onehot * logp, axis=1, keepdims=True)


def init_defect_head_params(w_cls, b_cls, compute_dtype=jnp.float32):
    """Build the kernel-layout classifier params ONCE (hoisted out of forward).

    w_cls: [2, H] nn.Linear weight, b_cls: [2] bias.
    Returns (w_t [H, 2] in compute_dtype, b [1, 2] f32).
    """
    w_t = jnp.asarray(w_cls).T.astype(compute_dtype)                # [H, 2]
    b = jnp.asarray(b_cls, jnp.float32).reshape(1, _NUM_CLASSES)    # [1, 2]
    return w_t, b


def _choose_block_b(batch, hidden, itemsize):
    """Largest batch tile that divides B and keeps the double-buffered vec blocks
    well under the scoped-VMEM limit on every generation (budgeted for v7x's
    64 MiB physical / 32 MiB default scoped VMEM)."""
    budget = 8 * 1024 * 1024
    for bt in (512, 256, 128, 64, 32, 16):
        if batch % bt == 0 and 2 * bt * hidden * itemsize <= budget:
            return bt
    return batch  # tiny/odd batch: single full-extent block


def defect_model_forward(hidden_states, w_t, b_p, labels=None, *, block_b=None):
    """'bert' (CLS-pooling) branch of DefectModel.forward.

    hidden_states: [B, S, H] encoder output (bf16 or f32); the encoder itself is
    external to this module. (w_t, b_p) come from init_defect_head_params().
    Returns (loss, prob) if labels is given, else prob — like the PyTorch module.
    """
    B, S, H = hidden_states.shape

    # CLS-token slice before the kernel: only B*H elements (native dtype) ever
    # reach VMEM; the full [B, S, H] slab never enters the kernel.
    # TODO(synk): this slice could be fused into the kernel via
    #             memory_space=pl.ANY + a manual strided make_async_copy to save
    #             one HBM round trip; modest win, omitted for simplicity.
    vec = hidden_states[:, 0, :]                                     # [B, H]

    has_labels = labels is not None
    if has_labels:
        labels2 = jnp.asarray(labels, jnp.int32).reshape(B, 1)
    else:
        labels2 = jnp.zeros((B, 1), jnp.int32)

    bt = block_b if block_b is not None else _choose_block_b(
        B, H, jnp.dtype(vec.dtype).itemsize)
    grid = (B // bt,)

    prob, rowloss = pl.pallas_call(
        _defect_head_kernel,
        out_shape=(
            jax.ShapeDtypeStruct((B, _NUM_CLASSES), jnp.float32),    # prob
            jax.ShapeDtypeStruct((B, 1), jnp.float32),               # per-row CE
        ),
        grid_spec=pltpu.PrefetchScalarGridSpec(
            num_scalar_prefetch=0,
            grid=grid,
            in_specs=[
                pl.BlockSpec((bt, H), lambda i: (i, 0)),             # vec blocks
                pl.BlockSpec((H, _NUM_CLASSES), lambda i: (0, 0)),   # weight (resident)
                pl.BlockSpec((1, _NUM_CLASSES), lambda i: (0, 0)),   # bias
                pl.BlockSpec((bt, 1), lambda i: (i, 0)),             # labels
            ],
            out_specs=(
                pl.BlockSpec((bt, _NUM_CLASSES), lambda i: (i, 0)),
                pl.BlockSpec((bt, 1), lambda i: (i, 0)),
            ),
        ),
        compiler_params=pltpu.CompilerParams(
            dimension_semantics=("parallel",),    # shards the batch over v7x's 2 TCs
            vmem_limit_bytes=32 * 1024 * 1024,
        ),
    )(vec, w_t, b_p, labels2)

    if not has_labels:
        return prob

    # CrossEntropyLoss mean reduction (tiny wrapper-side reduce over B values).
    # TODO(synk): ignore_index=-100 is not handled; labels must be in {0, 1}.
    loss = jnp.sum(rowloss) / jnp.float32(B)
    return loss, prob


if __name__ == "__main__":
    def reference(hidden_states, w_t, b_p, labels):
        vec = hidden_states[:, 0, :].astype(jnp.float32)
        logits = jnp.dot(vec, w_t.astype(jnp.float32),
                         precision=lax.Precision.HIGHEST) + b_p.astype(jnp.float32)
        prob = jax.nn.softmax(logits, axis=1)
        logp = jax.nn.log_softmax(logits, axis=1)
        loss = -jnp.mean(logp[jnp.arange(labels.shape[0]), labels])
        return loss, prob

    key = jax.random.PRNGKey(0)
    k_ids, k_hid, k_w, k_b, k_lab, k_hid2 = jax.random.split(key, 6)

    # ---- config 1: small f32 batch, single full-extent block (B == Bt) -------
    B, S, H = 2, 8, 32   # batch, max_source_length, config.hidden_size

    # source_ids would be token ids for the external encoder; mirrors
    # source_ids.view(-1, max_source_length) of the original forward.
    # TODO(synk): self.encoder has no in-module definition; its output
    #             hidden_states is synthesized here and fed to the kernel.
    source_ids = jax.random.randint(k_ids, (B, S), 0, 1000, dtype=jnp.int32)
    source_ids = source_ids.reshape(-1, S)

    hidden_states = jax.random.normal(k_hid, (B, S, H), dtype=jnp.float32)
    w_cls = jax.random.normal(k_w, (2, H), dtype=jnp.float32) * 0.02
    b_cls = jax.random.normal(k_b, (2,), dtype=jnp.float32) * 0.02
    labels = jnp.array([0, 1], dtype=jnp.int32)

    # Hoisted out of the per-call wrapper: built once at "model init".
    w_t, b_p = init_defect_head_params(w_cls, b_cls, compute_dtype=jnp.float32)

    loss, prob = defect_model_forward(hidden_states, w_t, b_p, labels)
    jax.block_until_ready((loss, prob))

    loss_ref, prob_ref = reference(hidden_states, w_t, b_p, labels)
    assert prob.shape == (B, 2), "prob shape mismatch (f32)"
    assert jnp.allclose(prob, prob_ref, atol=2e-3), "prob mismatch (f32)"
    assert jnp.allclose(loss, loss_ref, atol=1e-4), "loss mismatch (f32)"

    # ---- config 2: bf16 encoder output, B=32 with a 2-step batch grid --------
    B2 = 32
    hidden_states2 = jax.random.normal(k_hid2, (B2, S, H), dtype=jnp.bfloat16)
    labels_2 = jax.random.randint(k_lab, (B2,), 0, 2, dtype=jnp.int32)
    w_t_bf16, b_p2 = init_defect_head_params(w_cls, b_cls, compute_dtype=jnp.bfloat16)

    loss2, prob2 = defect_model_forward(hidden_states2, w_t_bf16, b_p2, labels_2,
                                        block_b=16)
    jax.block_until_ready((loss2, prob2))

    loss2_ref, prob2_ref = reference(hidden_states2, w_t_bf16, b_p2, labels_2)
    assert prob2.shape == (B2, 2), "prob shape mismatch (bf16)"
    assert jnp.allclose(prob2, prob2_ref, atol=2e-3), "prob mismatch (bf16)"
    assert jnp.allclose(loss2, loss2_ref, atol=1e-3), "loss mismatch (bf16)"

    print("KERNEL_OK")
</pallas_src>

<mosaic_0001>
module attributes {stable_mosaic.version = 11 : i64} {
  func.func @_defect_head_kernel(%arg0: i32, %arg1: memref<2x32xf32, #tpu.memory_space<vmem>>, %arg2: memref<32x2xf32, #tpu.memory_space<vmem>>, %arg3: memref<1x2xf32, #tpu.memory_space<vmem>>, %arg4: memref<2x1xi32, #tpu.memory_space<vmem>>, %arg5: memref<2x2xf32, #tpu.memory_space<vmem>>, %arg6: memref<2x1xf32, #tpu.memory_space<vmem>>) attributes {dimension_semantics = [#tpu.dimension_semantics<parallel>], iteration_bounds = array<i64: 1>, scalar_prefetch = 0 : i64, scratch_operands = 0 : i64, tpu.core_type = #tpu.core_type<tc>, window_params = [{transform_indices = @transform_0, window_bounds = array<i64: 2, 32>}, {pipeline_mode = #tpu.pipeline_mode<synchronous>, transform_indices = @transform_1, window_bounds = array<i64: 32, 2>}, {pipeline_mode = #tpu.pipeline_mode<synchronous>, transform_indices = @transform_2, window_bounds = array<i64: 1, 2>}, {transform_indices = @transform_3, window_bounds = array<i64: 2, 1>}, {transform_indices = @transform_4, window_bounds = array<i64: 2, 2>}, {transform_indices = @transform_5, window_bounds = array<i64: 2, 1>}]} {
    %c0 = arith.constant 0 : index
    %c0_0 = arith.constant 0 : index
    %0 = vector.load %arg1[%c0, %c0_0] : memref<2x32xf32, #tpu.memory_space<vmem>>, vector<2x32xf32>
    %c0_1 = arith.constant 0 : index
    %c0_2 = arith.constant 0 : index
    %1 = vector.load %arg2[%c0_1, %c0_2] : memref<32x2xf32, #tpu.memory_space<vmem>>, vector<32x2xf32>
    %cst = arith.constant dense<0.000000e+00> : vector<2x2xf32>
    %2 = tpu.matmul %0, %1, %cst {dimension_numbers = #tpu.dot_dimension_numbers<[1], [0], [0], [1], [0, 0, 1, 1], [], []>} : vector<2x32xf32>, vector<32x2xf32>, vector<2x2xf32> -> vector<2x2xf32>
    %c0_3 = arith.constant 0 : index
    %c0_4 = arith.constant 0 : index
    %3 = vector.load %arg3[%c0_3, %c0_4] : memref<1x2xf32, #tpu.memory_space<vmem>>, vector<1x2xf32>
    %4 = vector.broadcast %3 : vector<1x2xf32> to vector<2x2xf32>
    %5 = arith.addf %2, %4 : vector<2x2xf32>
    %cst_5 = arith.constant dense<0xFF800000> : vector<2xf32>
    %6 = vector.multi_reduction <maximumf>, %5, %cst_5 [1] : vector<2x2xf32> to vector<2xf32>
    %7 = vector.shape_cast %6 : vector<2xf32> to vector<2x1xf32>
    %8 = vector.broadcast %7 : vector<2x1xf32> to vector<2x2xf32>
    %9 = arith.subf %5, %8 : vector<2x2xf32>
    %10 = math.exp %9 : vector<2x2xf32>
    %cst_6 = arith.constant dense<0.000000e+00> : vector<2xf32>
    %11 = vector.multi_reduction <add>, %10, %cst_6 [1] : vector<2x2xf32> to vector<2xf32>
    %12 = vector.shape_cast %11 : vector<2xf32> to vector<2x1xf32>
    %13 = tpu.reciprocal %12 {approx = true} : vector<2x1xf32> -> vector<2x1xf32>
    %14 = vector.broadcast %13 : vector<2x1xf32> to vector<2x2xf32>
    %15 = arith.mulf %10, %14 : vector<2x2xf32>
    %c0_7 = arith.constant 0 : index
    %c0_8 = arith.constant 0 : index
    %16 = vector.load %arg5[%c0_7, %c0_8] : memref<2x2xf32, #tpu.memory_space<vmem>>, vector<2x2xf32>
    tpu.vector_store %arg5[%c0_7, %c0_8], %15 {strides = array<i32>} : memref<2x2xf32, #tpu.memory_space<vmem>>, vector<2x2xf32>,
    %17 = vector.broadcast %7 : vector<2x1xf32> to vector<2x2xf32>
    %18 = arith.subf %5, %17 : vector<2x2xf32>
    %19 = math.log %12 : vector<2x1xf32>
    %20 = vector.broadcast %19 : vector<2x1xf32> to vector<2x2xf32>
    %21 = arith.subf %18, %20 : vector<2x2xf32>
    %22 = tpu.iota {dimensions = array<i32: 1>} : vector<2x2xi32>
    %c0_9 = arith.constant 0 : index
    %c0_10 = arith.constant 0 : index
    %23 = vector.load %arg4[%c0_9, %c0_10] : memref<2x1xi32, #tpu.memory_space<vmem>>, vector<2x1xi32>
    %24 = vector.broadcast %23 : vector<2x1xi32> to vector<2x2xi32>
    %25 = arith.cmpi eq, %24, %22 : vector<2x2xi32>
    %26 = arith.extui %25 : vector<2x2xi1> to vector<2x2xi32>
    %27 = arith.sitofp %26 : vector<2x2xi32> to vector<2x2xf32>
    %28 = arith.mulf %27, %21 : vector<2x2xf32>
    %cst_11 = arith.constant dense<0.000000e+00> : vector<2xf32>
    %29 = vector.multi_reduction <add>, %28, %cst_11 [1] : vector<2x2xf32> to vector<2xf32>
    %30 = vector.shape_cast %29 : vector<2xf32> to vector<2x1xf32>
    %cst_12 = arith.constant 0.000000e+00 : f32
    %31 = vector.broadcast %cst_12 : f32 to vector<2x1xf32>
    %32 = arith.subf %31, %30 : vector<2x1xf32>
    %c0_13 = arith.constant 0 : index
    %c0_14 = arith.constant 0 : index
    %33 = vector.load %arg6[%c0_13, %c0_14] : memref<2x1xf32, #tpu.memory_space<vmem>>, vector<2x1xf32>
    tpu.vector_store %arg6[%c0_13, %c0_14], %32 {strides = array<i32>} : memref<2x1xf32, #tpu.memory_space<vmem>>, vector<2x1xf32>,
    return
  }
  func.func @transform_0(%arg0: i32) -> (i32, i32) {
    %c0_i32 = arith.constant 0 : i32
    %c0_i32_0 = arith.constant 0 : i32
    return %arg0, %c0_i32 : i32, i32
  }
  func.func @transform_1(%arg0: i32) -> (i32, i32) {
    %c0_i32 = arith.constant 0 : i32
    %c0_i32_0 = arith.constant 0 : i32
    %c0_i32_1 = arith.constant 0 : i32
    return %c0_i32, %c0_i32_0 : i32, i32
  }
  func.func @transform_2(%arg0: i32) -> (i32, i32) {
    %c0_i32 = arith.constant 0 : i32
    %c0_i32_0 = arith.constant 0 : i32
    %c0_i32_1 = arith.constant 0 : i32
    return %c0_i32, %c0_i32_0 : i32, i32
  }
  func.func @transform_3(%arg0: i32) -> (i32, i32) {
    %c0_i32 = arith.constant 0 : i32
    %c0_i32_0 = arith.constant 0 : i32
    return %arg0, %c0_i32 : i32, i32
  }
  func.func @transform_4(%arg0: i32) -> (i32, i32) {
    %c0_i32 = arith.constant 0 : i32
    %c0_i32_0 = arith.constant 0 : i32
    return %arg0, %c0_i32 : i32, i32
  }
  func.func @transform_5(%arg0: i32) -> (i32, i32) {
    %c0_i32 = arith.constant 0 : i32
    %c0_i32_0 = arith.constant 0 : i32
    return %arg0, %c0_i32 : i32, i32
  }
}

</mosaic_0001>

<bundles_post_ra>
// kernel: tpu_custom_call.1
= control target key start
LH: loop header
LB: loop body
LE: loop exit
PB: predicated region body
PF: predicated region fallthrough
CT: control target
= control target key end

     0   :  { %v218_v3 = vmov 0.0|0.0   ;;  %vm219_vm0 = vmmov 0   ;;  %v220_v6 = vmov 0.0   ;;  %s293_s0 = inlined_call_operand.vmem [shape: f32[2,32], index: 0, kind: input, shape index: {}]   ;;  %s294_s1 = inlined_call_operand.vmem [shape: f32[32,2], index: 1, kind: input, shape index: {}]   ;;  %s295_s2 = inlined_call_operand.vmem [shape: f32[1,2], index: 2, kind: input, shape index: {}]   ;;  %s296_s3 = inlined_call_operand.vmem [shape: s32[2,1], index: 3, kind: input, shape index: {}]   ;;  %s297_s4 = inlined_call_operand.hbm [shape: f32[2,2], index: 4, kind: output, shape index: {0}]   ;;  %s298_s5 = inlined_call_operand.vmem [shape: f32[2,1], index: 5, kind: output, shape index: {1}]  }
   0x1   :  { %v21_v0 = vld [vmem:[%s294_s1] sm:$0xff]  ;;  %v22_v1 = vld [vmem:[%s294_s1 + $0x8] sm:$0xff]  ;;  %v23_v2 = vld [vmem:[%s294_s1 + $0x10] sm:$0xff]  ;;  %175 = vmatprep.subr.bf16.mxu0 %v218_v3  ;;  %172 = vmatprep.mubr.msk.f32.mxu0 %vm219_vm0, %v220_v6 }
   0x2   :  { %v176_v4 = vpack.c.bf16 %v22_v1, %v21_v0  ;;  %v24_v5 = vld [vmem:[%s294_s1 + $0x18] sm:$0xff] }
   0x3   :  { %11 = vsyncpa [#allocation3], 0  ;;  %v179_v7 = vpack.c.bf16 %v24_v5, %v23_v2  ;;  %v20_v8 = vld [vmem:[%s293_s0] sm:$0x3]  ;;  %vm32_vm1 = vcmask 261120   ;;  %vm106_vm2 = vcmask 9216   ;;  %v122_v22 = vlaneseq }
   0x4   :  { %177 = vmatpush3.bf16.msra.mxu0 %v176_v4  ;;  %v156_v9 = vld [vmem:[%s295_s2] ss:$0 sm:$0xff]  ;;  %v221_v15 = vmov 0   ;;  %s222_s0 = smov [#allocation2]  }
   0x5   :  { %178 = vmatprep.subr.bf16.mxu0 %v218_v3  ;;  %v124_v14 = vld [vmem:[%s296_s3] sm:$0x3]  ;;  %186 = vset.pattern.permute.xlu1 %v221_v15  ;;  %v123_v23 = vand.u32 127, %v122_v22  ;;  %s144_s2 = sshll.u32 %s222_s0, 4  ;;  %s145_s2 = int_to_ptr.vmem [resolvable:$true] %s144_s2 }
   0x6   :  { %187 = vset.pattern.permute.xlu0 %v221_v15  ;;  %126 = vperm.xlu1 %186, %v124_v14   ;;  %s194_s3 = scalar_lea.vmem %s145_s2, 32  ;;  %p199_p1 = scmp.lt.s32.totalorder %s145_s2, %s145_s2 }
   0x7   :  { %p195_p0 = scmp.ne.s32.totalorder %s145_s2, %s194_s3  ;;  %p200_p2 = scmp.lt.s32.totalorder %s194_s3, %s194_s3 }
   0x8   :  { %180 = vmatpush3.bf16.msra.mxu0 %v179_v7 }
   0x9   :  { %p201_p3 = por %p200_p2, %p199_p1 }
   0xb   :  { %173 = vmatmul.mubr.msk.f32.vlgmr.msra.gmra.mrb[0].mxu0 %vm32_vm1, %v20_v8  ;;  %p202_p4 = pnand %p201_p3, %p195_p0 }
  0x85   :  { %v127_v24 = vpop.permute.xlu1 %126 }
  0x86   :  { %vm128_vm3 = vcmp.eq.s32.totalorder %v127_v24, %v123_v23 }
  0x87   :  { %v158_v29 = vsel %vm128_vm3, 1.0, %v220_v6 }
  0xde   :  { %v102_v10 = vpop.f32.mrb[0].mxu0 }
  0xdf   :  { %v103_v11 = vadd.f32 %v156_v9, %v102_v10  ;;  %v174_v12 = vpop.f32.mrb[1].mxu0 }
  0xe1   :  { %v107_v13 = vsel %vm106_vm2, %v103_v11, -inf }
  0xe2   :  { %108 = vmax.xlane.f32.xlu0 %v107_v13 }
 0x16f   :  { %v109_v16 = vpop.xlane.xlu0 %108 }
 0x170   :  { %v110_v17 = vsub.f32 %v103_v11, %v109_v16 }
 0x172   :  { %v111_v18 = vmul.f32 1.442695, %v110_v17 }
 0x174   :  { %188 = vpow2.f32 %v111_v18 }
 0x17e   :  { %v189_v19 = vpop.eup %188 }
 0x17f   :  { %v113_v20 = vsel %vm106_vm2, %v189_v19, 0.0 }
 0x180   :  { %114 = vadd.xlane.f32.xlu0 %v113_v20 }
 0x20d   :  { %v115_v21 = vpop.xlane.xlu0 %114 }
 0x20e   :  { %190 = vrcp.f32 %v115_v21 }
 0x20f   :  { %192 = vlog2.f32 %v115_v21 }
 0x218   :  { %v191_v25 = vpop.eup %190 }
 0x219   :  { %v193_v26 = vpop.eup %192  ;;  %v117_v27 = vmul.f32 %v191_v25, %v189_v19 }
 0x21a   :  { %v120_v28 = vmul.f32 0.6931472, %v193_v26 }
 0x21b   :  { %118 = vst.msk [vmem:[#allocation2] sm:$0x3] %vm106_vm2, %v117_v27 }
 0x21c   :  { %v121_v30 = vsub.f32 %v110_v17, %v120_v28 }
 0x21e   :  { %v131_v31 = vmul.f32 %v158_v29, %v121_v30 }
 0x220   :  { %v132_v32 = vsel %vm106_vm2, %v131_v31, 0.0 }
 0x221   :  { %133 = vadd.xlane.f32.xlu1 %v132_v32 }
 0x222   :  { %205 = shalt.err (!%p202_p4)
}
 0x223   :  { %s206_s8 = scalar_lea.hbm %s297_s4, 32 }
 0x224   :  { %p207_p5 = scmp.ne.s32.totalorder %s297_s4, %s206_s8  ;;  %p210_p6 = scmp.lt.u32.totalorder %s206_s8, %s297_s4 }
 0x226   :  { %p212_p7 = pnand %p210_p6, %p207_p5 }
 0x228   :  { %215 = shalt.err (!%p212_p7)
}
 0x229   :  { %147 = dma.vmem_to_hbm [thread:$0]  %s145_s2, 32, %s297_s4, [#allocation3]   ;;  %vm136_vm4 = vcmask 1024  }
 0x2ae   :  { %v134_v33 = vpop.xlane.xlu1 %133 }
 0x2af   :  { %v135_v34 = vsub.f32 0.0, %v134_v33 }
 0x2b1   :  { %137 = vst.msk [vmem:[%s298_s5] sm:$0x3] %vm136_vm4, %v135_v34 }
 0x2b2   :  { %216 = dma.done.wait [#allocation3], 32  }
 0x2b3   :  { %217 = vsyncadd [#allocation3], 4294967264 }
 0x2b4   :  { %155 = vsyncpa [#allocation3], 1 }

</bundles_post_ra>
